<compile_context>
chip_gen: v5e
topology: v5e:2x2
jax: 0.10.0
libtpu: 0.0.40
codegen_flags: <defaults>
</compile_context>

<pallas_src>
import jax
import jax.numpy as jnp
from jax.experimental import pallas as pl
from jax.experimental.pallas import tpu as pltpu


def _round_up(x, m):
    return (x + m - 1) // m * m


def _gather_add_kernel(idx_ref, table_ref, noise_ref, out_ref):
    """out[i, :] = table[idx[i], :] + noise[i, :] for one (TILE_N, D) tile."""
    tile_n = out_ref.shape[0]
    v = table_ref.shape[0]
    idx = idx_ref[...]                                          # (tile_n, 1) int32
    col = jax.lax.broadcasted_iota(jnp.int32, (tile_n, v), 1)   # (tile_n, v)
    onehot = (idx == col).astype(table_ref.dtype)               # exact 0/1 rows
    gathered = jnp.dot(onehot, table_ref[...],
                       preferred_element_type=jnp.float32)      # MXU row gather
    out_ref[...] = (gathered + noise_ref[...]).astype(out_ref.dtype)


def _pallas_gather_add(idx_flat, weight, noise, *, max_tile_n=512):
    """Fused embedding-row gather + noise add: returns weight[idx_flat] + noise."""
    n = idx_flat.shape[0]
    v, d = weight.shape

    tile_n = min(max_tile_n, _round_up(n, 8))
    n_pad = _round_up(n, tile_n)

    idx_p = jnp.pad(idx_flat.astype(jnp.int32), (0, n_pad - n)).reshape(n_pad, 1)
    noise_p = jnp.pad(noise.astype(weight.dtype), ((0, n_pad - n), (0, 0)))

    # VMEM budget: resident table + double-buffered (idx + noise + out) tiles.
    itemsize = jnp.dtype(weight.dtype).itemsize
    est = (v * d * itemsize
           + 2 * (2 * tile_n * d * itemsize + tile_n * 4)
           + (2 << 20))
    vmem_limit = int(min(max(est, 32 << 20), 100 << 20))

    out = pl.pallas_call(
        _gather_add_kernel,
        out_shape=jax.ShapeDtypeStruct((n_pad, d), weight.dtype),
        grid=(n_pad // tile_n,),
        in_specs=[
            pl.BlockSpec((tile_n, 1), lambda i: (i, 0)),   # per-tile indices
            pl.BlockSpec((v, d), lambda i: (0, 0)),        # table: VMEM-resident
            pl.BlockSpec((tile_n, d), lambda i: (i, 0)),   # per-tile noise
        ],
        out_specs=pl.BlockSpec((tile_n, d), lambda i: (i, 0)),
        compiler_params=pltpu.CompilerParams(
            dimension_semantics=("parallel",),   # tiles independent; shards on v7x
            vmem_limit_bytes=vmem_limit,
        ),
    )(idx_p, weight, noise_p)
    return out[:n]


def regularized_embedding(x, weight, *, stddev, training, key=None):
    """Pallas equivalent of RegularizedEmbedding.forward."""
    orig_shape = x.shape
    _, d = weight.shape
    if (not training) or stddev == 0.0:
        # Pure gather: native XLA gather avoids all per-kernel overhead.
        return weight[x]
    if key is None:
        key = jax.random.PRNGKey(0)
    idx_flat = x.reshape(-1).astype(jnp.int32)
    n = idx_flat.shape[0]
    noise = jax.random.normal(key, (n, d), dtype=weight.dtype) * jnp.asarray(
        stddev, weight.dtype)
    out = _pallas_gather_add(idx_flat, weight, noise)
    return out.reshape(*orig_shape, d)


if __name__ == "__main__":
    num_embeddings = 32
    embedding_dim = 128   # lane-friendly feature dim
    stddev = 0.1
    batch, seq = 2, 8

    root = jax.random.PRNGKey(0)
    k_w, k_idx, k_noise = jax.random.split(root, 3)

    # Deterministic parameter init: nn.Embedding default is N(0, 1).
    weight = jax.random.normal(k_w, (num_embeddings, embedding_dim), dtype=jnp.float32)
    x = jax.random.randint(k_idx, (batch, seq), 0, num_embeddings, dtype=jnp.int32)
    ref = weight[x]

    # 1) Eval mode: exact gather (Pallas bypassed by design).
    y_eval = jax.block_until_ready(
        regularized_embedding(x, weight, stddev=stddev, training=False))
    assert y_eval.shape == (batch, seq, embedding_dim)
    assert jnp.allclose(y_eval, ref, atol=1e-6), "eval-mode mismatch vs reference gather"

    # 2) Pallas fused path with zero noise: must reproduce the gather
    #    (tolerance covers MXU f32 matmul precision).
    zero_noise = jnp.zeros((batch * seq, embedding_dim), jnp.float32)
    y_gather = jax.block_until_ready(
        _pallas_gather_add(x.reshape(-1), weight, zero_noise))
    assert y_gather.shape == (batch * seq, embedding_dim)
    assert jnp.allclose(y_gather, ref.reshape(batch * seq, embedding_dim),
                        atol=5e-2, rtol=5e-2), "pallas gather mismatch"

    # 3) Training mode: gather + additive Gaussian noise of scale stddev.
    y_train = jax.block_until_ready(
        regularized_embedding(x, weight, stddev=stddev, training=True, key=k_noise))
    assert y_train.shape == (batch, seq, embedding_dim)
    assert bool(jnp.all(jnp.isfinite(y_train)))
    max_dev = float(jnp.max(jnp.abs(y_train - ref)))
    assert 0.0 < max_dev < 10.0 * stddev, f"noise magnitude off: {max_dev}"

    print("KERNEL_OK")
</pallas_src>

<mosaic_0001>
module attributes {stable_mosaic.version = 11 : i64} {
  func.func @_gather_add_kernel(%arg0: i32, %arg1: memref<16x1xi32, #tpu.memory_space<vmem>>, %arg2: memref<32x128xf32, #tpu.memory_space<vmem>>, %arg3: memref<16x128xf32, #tpu.memory_space<vmem>>, %arg4: memref<16x128xf32, #tpu.memory_space<vmem>>) attributes {dimension_semantics = [#tpu.dimension_semantics<parallel>], iteration_bounds = array<i64: 1>, scalar_prefetch = 0 : i64, scratch_operands = 0 : i64, tpu.core_type = #tpu.core_type<tc>, window_params = [{transform_indices = @transform_0, window_bounds = array<i64: 16, 1>}, {pipeline_mode = #tpu.pipeline_mode<synchronous>, transform_indices = @transform_1, window_bounds = array<i64: 32, 128>}, {transform_indices = @transform_2, window_bounds = array<i64: 16, 128>}, {transform_indices = @transform_3, window_bounds = array<i64: 16, 128>}]} {
    %c0 = arith.constant 0 : index
    %c0_0 = arith.constant 0 : index
    %0 = vector.load %arg1[%c0, %c0_0] : memref<16x1xi32, #tpu.memory_space<vmem>>, vector<16x1xi32>
    %1 = tpu.iota {dimensions = array<i32: 1>} : vector<16x32xi32>
    %2 = vector.broadcast %0 : vector<16x1xi32> to vector<16x32xi32>
    %3 = arith.cmpi eq, %2, %1 : vector<16x32xi32>
    %4 = arith.extui %3 : vector<16x32xi1> to vector<16x32xi32>
    %5 = arith.sitofp %4 : vector<16x32xi32> to vector<16x32xf32>
    %c0_1 = arith.constant 0 : index
    %c0_2 = arith.constant 0 : index
    %6 = vector.load %arg2[%c0_1, %c0_2] : memref<32x128xf32, #tpu.memory_space<vmem>>, vector<32x128xf32>
    %cst = arith.constant dense<0.000000e+00> : vector<16x128xf32>
    %7 = tpu.matmul %5, %6, %cst {dimension_numbers = #tpu.dot_dimension_numbers<[1], [0], [0], [1], [0, 0, 1, 1], [], []>} : vector<16x32xf32>, vector<32x128xf32>, vector<16x128xf32> -> vector<16x128xf32>
    %c0_3 = arith.constant 0 : index
    %c0_4 = arith.constant 0 : index
    %8 = vector.load %arg3[%c0_3, %c0_4] : memref<16x128xf32, #tpu.memory_space<vmem>>, vector<16x128xf32>
    %9 = arith.addf %7, %8 : vector<16x128xf32>
    %c0_5 = arith.constant 0 : index
    %c0_6 = arith.constant 0 : index
    %10 = vector.load %arg4[%c0_5, %c0_6] : memref<16x128xf32, #tpu.memory_space<vmem>>, vector<16x128xf32>
    tpu.vector_store %arg4[%c0_5, %c0_6], %9 {strides = array<i32>} : memref<16x128xf32, #tpu.memory_space<vmem>>, vector<16x128xf32>,
    return
  }
  func.func @transform_0(%arg0: i32) -> (i32, i32) {
    %c0_i32 = arith.constant 0 : i32
    %c0_i32_0 = arith.constant 0 : i32
    return %arg0, %c0_i32 : i32, i32
  }
  func.func @transform_1(%arg0: i32) -> (i32, i32) {
    %c0_i32 = arith.constant 0 : i32
    %c0_i32_0 = arith.constant 0 : i32
    %c0_i32_1 = arith.constant 0 : i32
    return %c0_i32, %c0_i32_0 : i32, i32
  }
  func.func @transform_2(%arg0: i32) -> (i32, i32) {
    %c0_i32 = arith.constant 0 : i32
    %c0_i32_0 = arith.constant 0 : i32
    return %arg0, %c0_i32 : i32, i32
  }
  func.func @transform_3(%arg0: i32) -> (i32, i32) {
    %c0_i32 = arith.constant 0 : i32
    %c0_i32_0 = arith.constant 0 : i32
    return %arg0, %c0_i32 : i32, i32
  }
}

</mosaic_0001>

<bundles_post_ra>
// kernel: tpu_custom_call.1
= control target key start
LH: loop header
LB: loop body
LE: loop exit
PB: predicated region body
PF: predicated region fallthrough
CT: control target
= control target key end

     0   :  { %8 = vsyncpa [#allocation3], 0  ;;  %s221_s0 = inlined_call_operand.vmem [shape: s32[16,1], index: 0, kind: input, shape index: {}]   ;;  %s222_s1 = inlined_call_operand.hbm [shape: f32[32,128], index: 1, kind: input, shape index: {}]   ;;  %s223_s2 = inlined_call_operand.vmem [shape: f32[16,128], index: 2, kind: input, shape index: {}]   ;;  %s224_s3 = inlined_call_operand.hbm [shape: f32[16,128], index: 3, kind: output, shape index: {}]  }
   0x1   :  { %9 = vsyncpa [#allocation4], 0  ;;  %s16_s14 = sshll.u32 %s222_s1, 4  ;;  %s171_s15 = smov [#allocation2]   ;;  %s17_s14 = int_to_ptr.hbm [resolvable:$true] %s16_s14 }
   0x2   :  { %s18_s16 = sshll.u32 %s171_s15, 4  ;;  %s172_s17 = smov 128   ;;  %s19_s16 = int_to_ptr.vmem [resolvable:$true] %s18_s16 }
   0x3   :  { %s173_s18 = smov 8  }
   0x4   :  { %24 = dma.hbm_to_vmem [thread:$0]  %s17_s14, 512, %s19_s16, [#allocation3], %s172_s17, %s172_s17, %s173_s18  }
   0x5   :  { %167 = dma.done.wait [#allocation3], 512  }
   0x6   :  { %168 = vsyncadd [#allocation3], 4294966784  ;;  %v174_v0 = vmov 0   ;;  %v31_v1 = vld [vmem:[%s221_s0] sm:$0xff]  ;;  %v50_v2 = vld [vmem:[#allocation2 + $0x18] sm:$0xff]  ;;  %v33_v7 = vlaneseq  ;;  %vm53_vm0 = vcmask 261120  }
   0x7   :  { %118 = vset.pattern.permute.xlu0 %v174_v0  ;;  %72 = vmatpush.msra.mxu0 %v50_v2  ;;  %v49_v3 = vld [vmem:[#allocation2 + $0x10] sm:$0xff]  ;;  %v48_v4 = vld [vmem:[#allocation2 + $0x8] sm:$0xff]  ;;  %v47_v6 = vld [vmem:[#allocation2] sm:$0xff]  ;;  %v175_v10 = vmov 0.0   ;;  %s176_s25 = smov [#allocation5]   ;;  %s91_s29 = sshll.u32 %s224_s3, 4  ;;  %s92_s29 = int_to_ptr.hbm [resolvable:$true] %s91_s29 }
   0x8   :  { %36 = vperm.xlu0 %118, %v31_v1   ;;  %108 = vmatpush.msra.mxu1 %v50_v2  ;;  %v32_v5 = vld [vmem:[%s221_s0 + $0x8] sm:$0xff]  ;;  %v34_v8 = vand.u32 127, %v33_v7  ;;  %v51_v14 = vld [vmem:[%s223_s2] sm:$0xff]  ;;  %s89_s26 = sshll.u32 %s176_s25, 4  ;;  %s90_s26 = int_to_ptr.vmem [resolvable:$true] %s89_s26 }
   0x9   :  { %73 = vmatpush.msra.mxu0 %v49_v3  ;;  %v52_v17 = vld [vmem:[%s223_s2 + $0x8] sm:$0xff] }
   0xa   :  { %109 = vmatpush.msra.mxu1 %v49_v3 }
   0xb   :  { %74 = vmatpush.msra.mxu0 %v48_v4 }
   0xc   :  { %110 = vmatpush.msra.mxu1 %v48_v4 }
   0xd   :  { %75 = vmatpush.msra.mxu0 %v47_v6 }
   0xe   :  { %111 = vmatpush.msra.mxu1 %v47_v6 }
  0x10   :  { %39 = vperm.xlu0 %118, %v32_v5  }
  0x7a   :  { %v37_v9 = vpop.permute.xlu0 %36 }
  0x7b   :  { %vm41_vm1 = vcmp.eq.s32.totalorder %v37_v9, %v34_v8 }
  0x7c   :  { %v104_v11 = vsel %vm41_vm1, 1.0, %v175_v10 }
  0x7d   :  { %106 = vmatmul.msk.f32.vlgmr.msra.gmra.mxu0 %vm53_vm0, %v104_v11 }
  0x82   :  { %v40_v12 = vpop.permute.xlu0 %39 }
  0x83   :  { %vm42_vm2 = vcmp.eq.s32.totalorder %v40_v12, %v34_v8 }
  0x84   :  { %v105_v13 = vsel %vm42_vm2, 1.0, %v175_v10 }
  0x85   :  { %107 = vmatmul.msk.f32.vlgmr.msra.gmra.mxu1 %vm53_vm0, %v105_v13 }
  0xfa   :  { %v77_v15 = vpop.f32.mrf.mxu0 }
  0xfb   :  { %v78_v16 = vadd.f32 %v77_v15, %v51_v14 }
  0xfd   :  { %83 = vst [vmem:[#allocation5] sm:$0xff] %v78_v16 }
 0x102   :  { %v80_v18 = vpop.f32.mrf.mxu1 }
 0x103   :  { %v81_v19 = vadd.f32 %v80_v18, %v52_v17 }
 0x105   :  { %84 = vst [vmem:[#allocation5 + $0x8] sm:$0xff] %v81_v19 }
 0x106   :  { %97 = dma.vmem_to_hbm [thread:$0]  %s90_s26, 256, %s92_s29, [#allocation4], %s172_s17, %s172_s17, %s173_s18  }
 0x107   :  { %169 = dma.done.wait [#allocation4], 256  }
 0x108   :  { %170 = vsyncadd [#allocation4], 4294967040 }
 0x109   :  { %102 = vsyncpa [#allocation3], 1 }
 0x10a   :  { %103 = vsyncpa [#allocation4], 1 }

</bundles_post_ra>
